<compile_context>
chip_gen: v7x
topology: tpu7x:2x2x1
jax: 0.10.0
libtpu: 0.0.40
codegen_flags: <defaults>
</compile_context>

<pallas_src>
import functools

import jax
import jax.numpy as jnp
from jax.experimental import pallas as pl
from jax.experimental.pallas import tpu as pltpu

D = 3    # spatial dimension (hparams.D)
H = 32   # hidden width (hparams.H)
N = 2    # electrons (helium)
Z = 2.0  # nuclear charge


def pairdrift_kernel(x_ref, w1_ref, w2_ref, w3_ref, b_ref, out_ref):
    """One batch tile.  x_ref: (D, 2*tb); lanes [0:tb]=electron0, [tb:2tb]=electron1."""
    X = x_ref[...]                                    # (D, W) f32
    W = X.shape[-1]

    def dot(w, a):
        # Weights may be bf16 (v6e/v7x option); cast the activation operand to
        # match and accumulate in f32 on the MXU.
        return jnp.dot(w, a.astype(w.dtype), preferred_element_type=jnp.float32)

    # Pairwise displacement with the right sign for each electron's lanes:
    # electron0 lanes get x0-x1, electron1 lanes get x1-x0.  Rolling by half
    # the lane width swaps the two electron halves (XLU slot, off the VPU).
    Dx = X - pltpu.roll(X, W // 2, 1)                 # (D, W)

    # Biases live in one consolidated slab (static, sublane-aligned slices).
    b1 = b_ref[0:2 * H, :]                            # (2H, 1)
    b2 = b_ref[2 * H:4 * H, :]                        # (2H, 1)
    b3 = b_ref[4 * H:4 * H + D, :]                    # (D, 1)

    # MakeFeatures: one block-diagonal K=6 matmul over the tiny (2D, W) concat.
    Xcat = jnp.concatenate([X, Dx], axis=0)           # (2D, W)
    h1 = jnp.clip(dot(w1_ref[...], Xcat) + b1, -1.0, 1.0)    # (2H, W)

    # combine1 + pair_lin fused into one (2H, 2H) matmul; the weight-only
    # "diagonal" pair feature is already folded into b2/b3 by the wrapper.
    g = jnp.clip(dot(w2_ref[...], h1) + b2, -1.0, 1.0)       # (2H, W)

    # combine2 fused along K: [wc2s^T | 0.5*wc2p^T] @ [s'; p'].
    out = dot(w3_ref[...], g) + b3                    # (D, W)

    # Kato cusp skip connections; rsqrt lowers to the EUP (its own VLIW slot).
    inv_nx = jax.lax.rsqrt(jnp.sum(X * X, axis=0, keepdims=True))    # (1, W)
    inv_nd = jax.lax.rsqrt(jnp.sum(Dx * Dx, axis=0, keepdims=True))  # (1, W)
    out_ref[...] = out + (-Z) * X * inv_nx + (-0.5) * Dx * inv_nd


def _prepare_params(params, matmul_dtype=jnp.float32):
    """Stack/transpose the Linear weights into the fused forms the kernel uses,
    fold the weight-only diagonal pair feature into the biases, and consolidate
    the three biases into one slab."""
    (ws, bs, wp, bp, wc1s, wc1p, bc1, wpl, bpl, wc2s, wc2p, bc2) = params
    f32 = jnp.float32

    pdiag = jnp.clip(bp, -1.0, 1.0)                           # pair feature, i == j
    pdiag2 = jnp.clip(pdiag @ wpl + bpl, -1.0, 1.0)
    bc1_eff = bc1 + pdiag @ (0.5 * wc1p)                      # (1, H)
    bc2_eff = bc2 + pdiag2 @ (0.5 * wc2p)                     # (1, D)

    zHD = jnp.zeros((H, D), f32)
    w1 = jnp.concatenate(
        [jnp.concatenate([ws.T, zHD], axis=1),
         jnp.concatenate([zHD, wp.T], axis=1)], axis=0)       # (2H, 2D)
    w2 = jnp.concatenate(
        [jnp.concatenate([wc1s.T, (0.5 * wc1p).T], axis=1),
         jnp.concatenate([jnp.zeros((H, H), f32), wpl.T], axis=1)],
        axis=0)                                               # (2H, 2H)
    w3 = jnp.concatenate([wc2s.T, (0.5 * wc2p).T], axis=1)    # (D, 2H)

    b1 = jnp.concatenate([bs, bp], axis=1).T                  # (2H, 1)
    b2 = jnp.concatenate([bc1_eff, bpl], axis=1).T            # (2H, 1)
    b3 = bc2_eff.T                                            # (D, 1)
    bcat = jnp.concatenate([b1, b2, b3], axis=0).astype(f32)  # (4H + D, 1)

    mdt = matmul_dtype
    return (w1.astype(mdt), w2.astype(mdt), w3.astype(mdt), bcat)


def _pick_tile(B, max_tb=2048):
    """Largest tb <= max_tb dividing B whose lane block (2*tb) is a 128-multiple
    (or spans the whole batch), preferring >=2 grid steps so v7x's second
    TensorCore has work.  On v5e/v6e the >=2-step preference is harmless."""
    fallback = None
    for tb in range(min(B, max_tb), 0, -1):
        if B % tb:
            continue
        if (2 * tb) % 128 != 0 and tb != B:
            continue
        if B // tb >= 2:
            return tb
        if fallback is None:
            fallback = tb
    return fallback if fallback is not None else B


def pairdrift_helium(x, params, tb=None, matmul_dtype=jnp.float32):
    """x: (B, N=2, D=3) float32 -> (B, 2, 3) drift.  tb = walkers per grid step
    (auto-picked if None).  matmul_dtype=jnp.bfloat16 enables the optional
    reduced-precision MXU path on v6e/v7x (validate tolerance before use)."""
    B = x.shape[0]
    assert x.shape[1:] == (N, D)
    if tb is None:
        tb = _pick_tile(B)
    assert B % tb == 0, "batch must be divisible by the tile size"
    # Lane-dense blocks: block last dim (2*tb) must be a 128-multiple unless it
    # spans the whole array.
    assert (2 * tb) % 128 == 0 or tb == B
    nt = B // tb
    Wlanes = 2 * tb

    kparams = _prepare_params(params, matmul_dtype)

    # Batch on the lane axis, grouped per tile: column ((i*2)+e)*tb + b holds
    # walker i*tb+b, electron e.  Pure XLA layout plumbing.
    xt = x.reshape(nt, tb, N, D).transpose(3, 0, 2, 1).reshape(D, N * B)

    data_spec = pl.BlockSpec((D, Wlanes), lambda i: (0, i))
    in_specs = [data_spec] + [pl.BlockSpec(p.shape, lambda i: (0, 0))
                              for p in kparams]

    # Advisory cost so XLA schedules / overlaps the relayout transposes around
    # the custom call instead of serializing everything.
    flops = 2 * (2 * H * 2 * D + 2 * H * 2 * H + D * 2 * H) * (N * B)
    param_bytes = sum(int(p.size) * p.dtype.itemsize for p in kparams)
    cost = pl.CostEstimate(
        flops=flops,
        transcendentals=2 * N * B,
        bytes_accessed=2 * N * B * D * 4 + param_bytes)

    out_t = pl.pallas_call(
        pairdrift_kernel,
        out_shape=jax.ShapeDtypeStruct((D, N * B), jnp.float32),
        grid_spec=pltpu.PrefetchScalarGridSpec(
            num_scalar_prefetch=0,
            grid=(nt,),
            in_specs=in_specs,
            out_specs=data_spec),
        compiler_params=pltpu.CompilerParams(
            dimension_semantics=("parallel",)),
        cost_estimate=cost,
    )(xt, *kparams)

    # Undo the tile-interleaved lane layout -> (B, 2, 3).
    return out_t.reshape(D, nt, N, tb).transpose(1, 3, 2, 0).reshape(B, N, D)


def init_params(key, zero_init_combine2=True):
    """PyTorch-Linear-style init U(-1/sqrt(fan_in), 1/sqrt(fan_in)).
    combine2 has zero_init=True in the original module; the flag lets the test
    use non-zero weights so the whole data path is numerically exercised
    (forward semantics do not depend on initialization)."""
    def linear(k, fan_in, fan_out, zero=False):
        if zero:
            return (jnp.zeros((fan_in, fan_out), jnp.float32),
                    jnp.zeros((1, fan_out), jnp.float32))
        kw, kb = jax.random.split(k)
        bound = float(fan_in) ** -0.5
        w = jax.random.uniform(kw, (fan_in, fan_out), jnp.float32, -bound, bound)
        b = jax.random.uniform(kb, (1, fan_out), jnp.float32, -bound, bound)
        return w, b

    keys = jax.random.split(key, 7)
    ws, bs = linear(keys[0], D, H)            # MakeFeatures: single-electron path
    wp, bp = linear(keys[1], D, H)            # MakeFeatures: pair path
    wc1s, bc1 = linear(keys[2], H, H)         # combine1: single path (+bias)
    wc1p, _ = linear(keys[3], H, H)           # combine1: pair path
    wpl, bpl = linear(keys[4], H, H)          # pair_lin
    wc2s, bc2 = linear(keys[5], H, D, zero=zero_init_combine2)   # combine2 single
    wc2p, _ = linear(keys[6], H, D, zero=zero_init_combine2)     # combine2 pair
    return (ws, bs, wp, bp, wc1s, wc1p, bc1, wpl, bpl, wc2s, wc2p, bc2)


def forward_ref(x, params):
    """Pure-JAX reference matching the PyTorch forward semantics."""
    (ws, bs, wp, bp, wc1s, wc1p, bc1, wpl, bpl, wc2s, wc2p, bc2) = params
    pairs = x[..., :, None, :] - x[..., None, :, :]          # (B, N, N, D)
    s = jnp.clip(x @ ws + bs[0], -1.0, 1.0)                  # (B, N, H)
    p = jnp.clip(pairs @ wp + bp[0], -1.0, 1.0)              # (B, N, N, H)
    s = jnp.clip(s @ wc1s + jnp.mean(p, axis=-2) @ wc1p + bc1[0], -1.0, 1.0)
    p = jnp.clip(p @ wpl + bpl[0], -1.0, 1.0)
    out = s @ wc2s + jnp.mean(p, axis=-2) @ wc2p + bc2[0]    # (B, N, D)
    out = out + (-Z) * x / jnp.linalg.norm(x, axis=-1, keepdims=True)
    dx = pairs[..., 0:1, 1, :]
    v = -0.5 * dx / jnp.linalg.norm(dx, axis=-1, keepdims=True)
    out = out + jnp.concatenate([v, -v], axis=-2)
    return out


if __name__ == "__main__":
    key = jax.random.PRNGKey(0)
    kx, kp = jax.random.split(key)

    B = 512          # walkers; auto tile -> tb=256, 2 parallel grid steps
    x = jax.random.normal(kx, (B, N, D), jnp.float32)
    # Non-zero combine2 weights so the check exercises every matmul; the
    # forward pass itself is identical to the zero_init=True module.
    params = init_params(kp, zero_init_combine2=False)

    fn = jax.jit(functools.partial(pairdrift_helium))
    out = jax.block_until_ready(fn(x, params))

    ref = forward_ref(x, params)
    assert out.shape == (B, N, D)
    assert bool(jnp.all(jnp.isfinite(out)))
    max_err = float(jnp.max(jnp.abs(out - ref)))
    assert bool(jnp.allclose(out, ref, atol=1e-4, rtol=1e-4)), max_err
    print("KERNEL_OK")
</pallas_src>

<mosaic_0001>
module attributes {stable_mosaic.version = 11 : i64} {
  func.func @pairdrift_kernel(%arg0: i32, %arg1: memref<3x512xf32, #tpu.memory_space<vmem>>, %arg2: memref<64x6xf32, #tpu.memory_space<vmem>>, %arg3: memref<64x64xf32, #tpu.memory_space<vmem>>, %arg4: memref<3x64xf32, #tpu.memory_space<vmem>>, %arg5: memref<131x1xf32, #tpu.memory_space<vmem>>, %arg6: memref<3x512xf32, #tpu.memory_space<vmem>>) attributes {dimension_semantics = [#tpu.dimension_semantics<parallel>], iteration_bounds = array<i64: 2>, scalar_prefetch = 0 : i64, scratch_operands = 0 : i64, tpu.core_type = #tpu.core_type<tc>, window_params = [{transform_indices = @transform_0, window_bounds = array<i64: 3, 512>}, {pipeline_mode = #tpu.pipeline_mode<synchronous>, transform_indices = @transform_1, window_bounds = array<i64: 64, 6>}, {pipeline_mode = #tpu.pipeline_mode<synchronous>, transform_indices = @transform_2, window_bounds = array<i64: 64, 64>}, {pipeline_mode = #tpu.pipeline_mode<synchronous>, transform_indices = @transform_3, window_bounds = array<i64: 3, 64>}, {pipeline_mode = #tpu.pipeline_mode<synchronous>, transform_indices = @transform_4, window_bounds = array<i64: 131, 1>}, {transform_indices = @transform_5, window_bounds = array<i64: 3, 512>}]} {
    %c0 = arith.constant 0 : index
    %c0_0 = arith.constant 0 : index
    %0 = vector.load %arg1[%c0, %c0_0] : memref<3x512xf32, #tpu.memory_space<vmem>>, vector<3x512xf32>
    %c256_i32 = arith.constant 256 : i32
    %1 = tpu.dynamic_rotate %0 by %c256_i32 dim 1 : vector<3x512xf32>, i32 -> vector<3x512xf32>
    %2 = arith.subf %0, %1 : vector<3x512xf32>
    %c0_1 = arith.constant 0 : index
    %c0_2 = arith.constant 0 : index
    %3 = vector.load %arg5[%c0_1, %c0_2] : memref<131x1xf32, #tpu.memory_space<vmem>>, vector<64x1xf32>
    %c64 = arith.constant 64 : index
    %c0_3 = arith.constant 0 : index
    %4 = vector.load %arg5[%c64, %c0_3] : memref<131x1xf32, #tpu.memory_space<vmem>>, vector<64x1xf32>
    %c128 = arith.constant 128 : index
    %c0_4 = arith.constant 0 : index
    %5 = vector.load %arg5[%c128, %c0_4] : memref<131x1xf32, #tpu.memory_space<vmem>>, vector<3x1xf32>
    %6 = tpu.concatenate %0, %2 in 0 : vector<3x512xf32>, vector<3x512xf32> -> vector<6x512xf32>
    %c0_5 = arith.constant 0 : index
    %c0_6 = arith.constant 0 : index
    %7 = vector.load %arg2[%c0_5, %c0_6] : memref<64x6xf32, #tpu.memory_space<vmem>>, vector<64x6xf32>
    %cst = arith.constant dense<0.000000e+00> : vector<64x512xf32>
    %8 = tpu.matmul %7, %6, %cst {dimension_numbers = #tpu.dot_dimension_numbers<[1], [0], [0], [1], [0, 0, 1, 1], [], []>} : vector<64x6xf32>, vector<6x512xf32>, vector<64x512xf32> -> vector<64x512xf32>
    %9 = vector.broadcast %3 : vector<64x1xf32> to vector<64x512xf32>
    %10 = arith.addf %8, %9 : vector<64x512xf32>
    %cst_7 = arith.constant -1.000000e+00 : f32
    %cst_8 = arith.constant 1.000000e+00 : f32
    %11 = vector.broadcast %cst_7 : f32 to vector<64x512xf32>
    %12 = arith.maximumf %11, %10 : vector<64x512xf32>
    %13 = vector.broadcast %cst_8 : f32 to vector<64x512xf32>
    %14 = arith.minimumf %13, %12 : vector<64x512xf32>
    %c0_9 = arith.constant 0 : index
    %c0_10 = arith.constant 0 : index
    %15 = vector.load %arg3[%c0_9, %c0_10] : memref<64x64xf32, #tpu.memory_space<vmem>>, vector<64x64xf32>
    %cst_11 = arith.constant dense<0.000000e+00> : vector<64x512xf32>
    %16 = tpu.matmul %15, %14, %cst_11 {dimension_numbers = #tpu.dot_dimension_numbers<[1], [0], [0], [1], [0, 0, 1, 1], [], []>} : vector<64x64xf32>, vector<64x512xf32>, vector<64x512xf32> -> vector<64x512xf32>
    %17 = vector.broadcast %4 : vector<64x1xf32> to vector<64x512xf32>
    %18 = arith.addf %16, %17 : vector<64x512xf32>
    %cst_12 = arith.constant -1.000000e+00 : f32
    %cst_13 = arith.constant 1.000000e+00 : f32
    %19 = vector.broadcast %cst_12 : f32 to vector<64x512xf32>
    %20 = arith.maximumf %19, %18 : vector<64x512xf32>
    %21 = vector.broadcast %cst_13 : f32 to vector<64x512xf32>
    %22 = arith.minimumf %21, %20 : vector<64x512xf32>
    %c0_14 = arith.constant 0 : index
    %c0_15 = arith.constant 0 : index
    %23 = vector.load %arg4[%c0_14, %c0_15] : memref<3x64xf32, #tpu.memory_space<vmem>>, vector<3x64xf32>
    %cst_16 = arith.constant dense<0.000000e+00> : vector<3x512xf32>
    %24 = tpu.matmul %23, %22, %cst_16 {dimension_numbers = #tpu.dot_dimension_numbers<[1], [0], [0], [1], [0, 0, 1, 1], [], []>} : vector<3x64xf32>, vector<64x512xf32>, vector<3x512xf32> -> vector<3x512xf32>
    %25 = vector.broadcast %5 : vector<3x1xf32> to vector<3x512xf32>
    %26 = arith.addf %24, %25 : vector<3x512xf32>
    %27 = arith.mulf %0, %0 : vector<3x512xf32>
    %cst_17 = arith.constant dense<0.000000e+00> : vector<512xf32>
    %28 = vector.multi_reduction <add>, %27, %cst_17 [0] : vector<3x512xf32> to vector<512xf32>
    %29 = vector.shape_cast %28 : vector<512xf32> to vector<1x512xf32>
    %30 = math.rsqrt %29 : vector<1x512xf32>
    %31 = arith.mulf %2, %2 : vector<3x512xf32>
    %cst_18 = arith.constant dense<0.000000e+00> : vector<512xf32>
    %32 = vector.multi_reduction <add>, %31, %cst_18 [0] : vector<3x512xf32> to vector<512xf32>
    %33 = vector.shape_cast %32 : vector<512xf32> to vector<1x512xf32>
    %34 = math.rsqrt %33 : vector<1x512xf32>
    %cst_19 = arith.constant -2.000000e+00 : f32
    %35 = vector.broadcast %cst_19 : f32 to vector<3x512xf32>
    %36 = arith.mulf %35, %0 : vector<3x512xf32>
    %37 = vector.broadcast %30 : vector<1x512xf32> to vector<3x512xf32>
    %38 = arith.mulf %36, %37 : vector<3x512xf32>
    %39 = arith.addf %26, %38 : vector<3x512xf32>
    %cst_20 = arith.constant -5.000000e-01 : f32
    %40 = vector.broadcast %cst_20 : f32 to vector<3x512xf32>
    %41 = arith.mulf %40, %2 : vector<3x512xf32>
    %42 = vector.broadcast %34 : vector<1x512xf32> to vector<3x512xf32>
    %43 = arith.mulf %41, %42 : vector<3x512xf32>
    %44 = arith.addf %39, %43 : vector<3x512xf32>
    %c0_21 = arith.constant 0 : index
    %c0_22 = arith.constant 0 : index
    %45 = vector.load %arg6[%c0_21, %c0_22] : memref<3x512xf32, #tpu.memory_space<vmem>>, vector<3x512xf32>
    tpu.vector_store %arg6[%c0_21, %c0_22], %44 {strides = array<i32>} : memref<3x512xf32, #tpu.memory_space<vmem>>, vector<3x512xf32>,
    return
  }
  func.func @transform_0(%arg0: i32) -> (i32, i32) {
    %c0_i32 = arith.constant 0 : i32
    %c0_i32_0 = arith.constant 0 : i32
    return %c0_i32, %arg0 : i32, i32
  }
  func.func @transform_1(%arg0: i32) -> (i32, i32) {
    %c0_i32 = arith.constant 0 : i32
    %c0_i32_0 = arith.constant 0 : i32
    %c0_i32_1 = arith.constant 0 : i32
    return %c0_i32, %c0_i32_0 : i32, i32
  }
  func.func @transform_2(%arg0: i32) -> (i32, i32) {
    %c0_i32 = arith.constant 0 : i32
    %c0_i32_0 = arith.constant 0 : i32
    %c0_i32_1 = arith.constant 0 : i32
    return %c0_i32, %c0_i32_0 : i32, i32
  }
  func.func @transform_3(%arg0: i32) -> (i32, i32) {
    %c0_i32 = arith.constant 0 : i32
    %c0_i32_0 = arith.constant 0 : i32
    %c0_i32_1 = arith.constant 0 : i32
    return %c0_i32, %c0_i32_0 : i32, i32
  }
  func.func @transform_4(%arg0: i32) -> (i32, i32) {
    %c0_i32 = arith.constant 0 : i32
    %c0_i32_0 = arith.constant 0 : i32
    %c0_i32_1 = arith.constant 0 : i32
    return %c0_i32, %c0_i32_0 : i32, i32
  }
  func.func @transform_5(%arg0: i32) -> (i32, i32) {
    %c0_i32 = arith.constant 0 : i32
    %c0_i32_0 = arith.constant 0 : i32
    return %c0_i32, %arg0 : i32, i32
  }
}

</mosaic_0001>

<bundles_post_ra>
// kernel: pairdrift_helium.1
= control target key start
LH: loop header
LB: loop body
LE: loop exit
PB: predicated region body
PF: predicated region fallthrough
CT: control target
= control target key end

     0   :  { %s1603_s18 = smov 0   ;;  %s1845_s0 = inlined_call_operand.vmem [shape: f32[3,1024], index: 0, kind: input, shape index: {}]   ;;  %s1846_s1 = inlined_call_operand.vmem [shape: f32[64,6], index: 1, kind: input, shape index: {}]   ;;  %s1847_s2 = inlined_call_operand.vmem [shape: f32[64,64], index: 2, kind: input, shape index: {}]   ;;  %s1848_s3 = inlined_call_operand.vmem [shape: f32[3,64], index: 3, kind: input, shape index: {}]   ;;  %s1849_s4 = inlined_call_operand.vmem [shape: f32[131,1], index: 4, kind: input, shape index: {}]   ;;  %s1850_s5 = inlined_call_operand.vmem [shape: f32[3,1024], index: 5, kind: output, shape index: {}]  }
   0x1 LB: > { %s1356_s19 = sadd.s32 4294967295, %s1569_s18   ;;  %p1360_p0 = scmp.ge.s32.totalorder %s1569_s18, 1  ;;  %s1569_s18 = sphi %s1603_s18, %s15_s18  }
   0x2   : > { %p188_p1 = scmp.lt.s32.totalorder %s1569_s18, 3 }
   0x4   : > { %p189_p2 = pnand %p1360_p0, %p188_p1 }
   0x5   : > { %s1361_s20 = sshll.u32 (!%p189_p2), %s1356_s19, 2  ;;  %v1571_v0 = vmov (!%p189_p2), 0.0   ;;  %v1572_v1 = vmov (!%p189_p2), 0   ;;  %v240_v2 = vld [vmem:[%s1849_s4] sm:$0xff] (!%p189_p2)  ;;  %v242_v3 = vld [vmem:[%s1849_s4 + $0x10] sm:$0xff] (!%p189_p2)  ;;  %v241_v4 = vld [vmem:[%s1849_s4 + $0x8] sm:$0xff] (!%p189_p2) }
   0x6   : > { %192 = sbr.rel (%p189_p2) target bundleno = 754 (0x2f2), region = 40  ;;  %p217_p3 = scmp.lt.s32.totalorder (!%p189_p2), %s1361_s20, 7  ;;  %426 = vmatprep.mubr.f32.mxu0 (!%p189_p2), %v1571_v0  ;;  %539 = vmatprep.mubr.f32.mxu1 (!%p189_p2), %v1571_v0  ;;  %v243_v5 = vld [vmem:[%s1849_s4 + $0x18] sm:$0xff] (!%p189_p2)  ;;  %v244_v10 = vld [vmem:[%s1849_s4 + $0x20] sm:$0xff] (!%p189_p2)  ;;  %v245_v13 = vld [vmem:[%s1849_s4 + $0x28] sm:$0xff] (!%p189_p2)  ;;  %vm271_vm0 = vcmask (!%p189_p2), 1042432  }
   0x7   : > { %1543 = vset.pattern.permute.xlu0 (!%p189_p2), %v1572_v1  ;;  %1544 = vset.pattern.permute.xlu1 (!%p189_p2), %v1572_v1  ;;  %v246_v16 = vld [vmem:[%s1849_s4 + $0x30] sm:$0xff] (!%p189_p2)  ;;  %v247_v19 = vld [vmem:[%s1849_s4 + $0x38] sm:$0xff] (!%p189_p2)  ;;  %vm349_vm1 = vcmask (!%p189_p2), 1045504   ;;  %v276_v27 = vld [vmem:[%s1846_s1] sm:$0xff] (!%p189_p2)  ;;  %vm324_vm2 = vcmask (!%p189_p2), 48128   ;;  %vm700_vm3 = vcmask (!%p189_p2), 523264  }
   0x8   : > { %286 = vperm.xlu0 (!%p189_p2), %1543, %v240_v2   ;;  %296 = vperm.xlu1 (!%p189_p2), %1544, %v242_v3   ;;  %v248_v29 = vld [vmem:[%s1849_s4 + $0x40] sm:$0xff] (!%p189_p2)  ;;  %v249_v30 = vld [vmem:[%s1849_s4 + $0x48] sm:$0xff] (!%p189_p2)  ;;  %v250_v32 = vld [vmem:[%s1849_s4 + $0x50] sm:$0xff] (!%p189_p2) }
   0x9   : > { %v277_v31 = vld [vmem:[%s1846_s1 + $0x8] sm:$0xff] (!%p189_p2)  ;;  %v251_v33 = vld [vmem:[%s1849_s4 + $0x58] sm:$0xff] (!%p189_p2)  ;;  %v278_v34 = vld [vmem:[%s1846_s1 + $0x10] sm:$0xff] (!%p189_p2) }
   0xa   : > { %v252_v35 = vld [vmem:[%s1849_s4 + $0x60] sm:$0xff] (!%p189_p2)  ;;  %v253_v36 = vld [vmem:[%s1849_s4 + $0x68] sm:$0xff] (!%p189_p2)  ;;  %v279_v37 = vld [vmem:[%s1846_s1 + $0x18] sm:$0xff] (!%p189_p2) }
   0xb   : > { %v254_v38 = vld [vmem:[%s1849_s4 + $0x70] sm:$0xff] (!%p189_p2)  ;;  %v255_v39 = vld [vmem:[%s1849_s4 + $0x78] sm:$0xff] (!%p189_p2)  ;;  %v280_v40 = vld [vmem:[%s1846_s1 + $0x20] sm:$0xff] (!%p189_p2) }
   0xc   : > { %291 = vperm.xlu0 (!%p189_p2), %1543, %v241_v4   ;;  %301 = vperm.xlu1 (!%p189_p2), %1544, %v243_v5   ;;  %v256_v41 = vld [vmem:[%s1849_s4 + $0x80] sm:$0x7] (!%p189_p2)  ;;  %v281_v42 = vld [vmem:[%s1846_s1 + $0x28] sm:$0xff] (!%p189_p2)  ;;  %v282_v43 = vld [vmem:[%s1846_s1 + $0x30] sm:$0xff] (!%p189_p2) }
   0xd   : > { %s1852_s20 = smov (!%p217_p3, %s1361_s20), 7  ;;  %v283_v44 = vld [vmem:[%s1846_s1 + $0x38] sm:$0xff] }
   0xe   : > { %s1362_s25 = sshll.u32 %s1852_s20, 2 }
   0xf   : > { %s220_s30 = scalar_lea.vmem %s1845_s0, %s1362_s25  ;;  %s226_s29 = scalar_lea.vmem %s1850_s5, %s1362_s25 }
  0x10   : > { %v1633_v6 = vld [vmem:[%s220_s30] sm:$0x77]  ;;  %v1635_v7 = vld [vmem:[%s220_s30 + $0x8] sm:$0x77]  ;;  %306 = vperm.xlu0 %1543, %v244_v10   ;;  %311 = vperm.xlu1 %1544, %v245_v13  }
  0x11   : > { %v232_v8 = vcombine.high %v1633_v6, %v1633_v6  ;;  %v233_v9 = vcombine.high %v1635_v7, %v1635_v7 }
  0x13   : > { %v234_v11 = vcombine.low %v1635_v7, %v233_v9  ;;  %v235_v12 = vcombine.low %v1633_v6, %v232_v8 }
  0x14   : > { %316 = vperm.xlu0 %1543, %v246_v16   ;;  %321 = vperm.xlu1 %1544, %v247_v19  }
  0x15   : > { %v1650_v14 = vsub.f32 %v1633_v6, %v234_v11  ;;  %v1653_v15 = vsub.f32 %v1635_v7, %v235_v12 }
  0x17   : > { %v261_v17 = vcombine.high %v1650_v14, %v1650_v14  ;;  %v262_v18 = vcombine.high %v1653_v15, %v1653_v15  ;;  %v263_v20 = vrot.slane %v1650_v14, 5  ;;  %v265_v21 = vrot.slane %v1653_v15, 5 }
  0x18   : > { %662 = vperm.xlu0 %1543, %v248_v29   ;;  %667 = vperm.xlu1 %1544, %v249_v30  }
  0x19   : > { %v264_v22 = vrot.slane %v261_v17, 5  ;;  %v266_v23 = vrot.slane %v262_v18, 5  ;;  %v272_v24 = vsel %vm271_vm0, %v1633_v6, %v263_v20  ;;  %v274_v26 = vsel %vm271_vm0, %v1635_v7, %v265_v21 }
  0x1b   : > { %v273_v25 = vsel %vm271_vm0, %v232_v8, %v264_v22  ;;  %v275_v28 = vsel %vm271_vm0, %v233_v9, %v266_v23 }
  0x1c   : > { %1365 = vmatprep.subr.msk.mxu0 %vm349_vm1, %v273_v25  ;;  %1375 = vmatprep.subr.msk.mxu1 %vm349_vm1, %v275_v28 }
  0x1d   : > { %1366 = vmatpush1.msk.msra.mxu0 %vm349_vm1, %v272_v24  ;;  %1376 = vmatpush1.msk.msra.mxu1 %vm349_vm1, %v274_v26 }
  0x1e   : > { %1367 = vmatmul.mubr.msk.f32.vlgmr.msra.gmra.mrb[0].mxu0 %vm324_vm2, %v276_v27  ;;  %1377 = vmatmul.mubr.msk.f32.vlgmr.msra.gmra.mrb[0].mxu1 %vm324_vm2, %v276_v27 }
  0x1f   : > { %432 = vmatprep.mubr.f32.mxu0 %v1571_v0  ;;  %545 = vmatprep.mubr.f32.mxu1 %v1571_v0 }
  0x20   : > { %672 = vperm.xlu0 %1543, %v250_v32   ;;  %677 = vperm.xlu1 %1544, %v251_v33  }
  0x22   : > { %1368 = vmatmul.mubr.msk.f32.gmra.mrb[2].mxu0 %vm324_vm2, %v277_v31  ;;  %1378 = vmatmul.mubr.msk.f32.gmra.mrb[2].mxu1 %vm324_vm2, %v277_v31 }
  0x23   : > { %438 = vmatprep.mubr.f32.mxu0 %v1571_v0  ;;  %551 = vmatprep.mubr.f32.mxu1 %v1571_v0 }
  0x24   : > { %682 = vperm.xlu0 %1543, %v252_v35   ;;  %687 = vperm.xlu1 %1544, %v253_v36  }
  0x26   : > { %1369 = vmatmul.mubr.msk.f32.gmra.mrb[4].mxu0 %vm324_vm2, %v278_v34  ;;  %1379 = vmatmul.mubr.msk.f32.gmra.mrb[4].mxu1 %vm324_vm2, %v278_v34 }
  0x27   : > { %444 = vmatprep.mubr.f32.mxu0 %v1571_v0  ;;  %557 = vmatprep.mubr.f32.mxu1 %v1571_v0 }
  0x28   : > { %692 = vperm.xlu0 %1543, %v254_v38   ;;  %697 = vperm.xlu1 %1544, %v255_v39  }
  0x2a   : > { %1370 = vmatmul.mubr.msk.f32.gmra.mrb[6].mxu0 %vm324_vm2, %v279_v37  ;;  %1380 = vmatmul.mubr.msk.f32.gmra.mrb[6].mxu1 %vm324_vm2, %v279_v37 }
  0x2b   : > { %450 = vmatprep.mubr.f32.mxu0 %v1571_v0  ;;  %563 = vmatprep.mubr.f32.mxu1 %v1571_v0 }
  0x2c   : > { %1018 = vperm.xlu0 %1543, %v256_v41  }
  0x2e   : > { %1371 = vmatmul.mubr.msk.f32.gmra.mrb[8].mxu0 %vm324_vm2, %v280_v40  ;;  %1381 = vmatmul.mubr.msk.f32.gmra.mrb[8].mxu1 %vm324_vm2, %v280_v40 }
  0x2f   : > { %456 = vmatprep.mubr.f32.mxu0 %v1571_v0  ;;  %569 = vmatprep.mubr.f32.mxu1 %v1571_v0 }
  0x32   : > { %1372 = vmatmul.mubr.msk.f32.gmra.mrb[10].mxu0 %vm324_vm2, %v281_v42  ;;  %1382 = vmatmul.mubr.msk.f32.gmra.mrb[10].mxu1 %vm324_vm2, %v281_v42 }
  0x33   : > { %462 = vmatprep.mubr.f32.mxu0 %v1571_v0  ;;  %575 = vmatprep.mubr.f32.mxu1 %v1571_v0 }
  0x36   : > { %1373 = vmatmul.mubr.msk.f32.gmra.mrb[12].mxu0 %vm324_vm2, %v282_v43  ;;  %1383 = vmatmul.mubr.msk.f32.gmra.mrb[12].mxu1 %vm324_vm2, %v282_v43 }
  0x37   : > { %468 = vmatprep.mubr.f32.mxu0 %v1571_v0  ;;  %581 = vmatprep.mubr.f32.mxu1 %v1571_v0 }
  0x3a   : > { %1374 = vmatmul.mubr.msk.f32.gmra.mrb[14].mxu0 %vm324_vm2, %v283_v44  ;;  %1384 = vmatmul.mubr.msk.f32.gmra.mrb[14].mxu1 %vm324_vm2, %v283_v44 }
  0x3b   : > { %789 = vmatprep.mubr.f32.mxu0 %v1571_v0  ;;  %902 = vmatprep.mubr.f32.mxu1 %v1571_v0 }
  0x87   : > { %v287_v45 = vpop.permute.xlu0 %286  ;;  %v297_v59 = vpop.permute.xlu1 %296 }
  0x8b   : > { %v292_v51 = vpop.permute.xlu0 %291  ;;  %v302_v22 = vpop.permute.xlu1 %301 }
  0xf1   : > { %v428_v46 = vpop.f32.mrb[0].mxu0  ;;  %v541_v47 = vpop.f32.mrb[0].mxu1 }
  0xf2   : > { %v430_v48 = vpop.f32.mrb[1].mxu0  ;;  %v543_v49 = vpop.f32.mrb[1].mxu1  ;;  %v429_v50 = vadd.f32 %v428_v46, %v287_v45  ;;  %v542_v52 = vadd.f32 %v541_v47, %v287_v45 }
  0xf3   : > { %v431_v53 = vadd.f32 %v430_v48, %v287_v45  ;;  %v544_v55 = vadd.f32 %v543_v49, %v287_v45  ;;  %v307_v46 = vpop.permute.xlu0 %306 }
  0xf4   : > { %v1385_v63 = vclamps-f32 %v429_v50, 1.0  ;;  %v1387_v3 = vclamps-f32 %v542_v52, 1.0  ;;  %v312_v52 = vpop.permute.xlu1 %311 }
  0xf5   : > { %v434_v54 = vpop.f32.mrb[2].mxu0  ;;  %v547_v57 = vpop.f32.mrb[2].mxu1  ;;  %v1386_v4 = vclamps-f32 %v431_v53, 1.0  ;;  %v1388_v10 = vclamps-f32 %v544_v55, 1.0 }
  0xf6   : > { %v435_v56 = vadd.f32 %v434_v54, %v292_v51  ;;  %v436_v58 = vpop.f32.mrb[3].mxu0  ;;  %v548_v60 = vadd.f32 %v547_v57, %v292_v51  ;;  %v549_v62 = vpop.f32.mrb[3].mxu1 }
  0xf7   : > { %v437_v61 = vadd.f32 %v436_v58, %v292_v51  ;;  %v550_v2 = vadd.f32 %v549_v62, %v292_v51 }
  0xf8   : > { %v1389_v1 = vclamps-f32 %v435_v56, 1.0  ;;  %v1391_v5 = vclamps-f32 %v548_v60, 1.0 }
  0xf9   : > { %v1390_v8 = vclamps-f32 %v437_v61, 1.0  ;;  %v440_v9 = vpop.f32.mrb[4].mxu0  ;;  %v1392_v12 = vclamps-f32 %v550_v2, 1.0  ;;  %v553_v13 = vpop.f32.mrb[4].mxu1 }
  0xfa   : > { %v1471_v11 = vpack.c.bf16 %v1389_v1, %v1385_v63  ;;  %v442_v16 = vpop.f32.mrb[5].mxu0  ;;  %v1487_v17 = vpack.c.bf16 %v1391_v5, %v1387_v3  ;;  %v555_v19 = vpop.f32.mrb[5].mxu1  ;;  %v441_v21 = vadd.f32 %v440_v9, %v297_v59  ;;  %v554_v23 = vadd.f32 %v553_v13, %v297_v59 }
  0xfb   : > { %v1469_v18 = vpack.c.bf16 %v1390_v8, %v1386_v4  ;;  %v1485_v20 = vpack.c.bf16 %v1392_v12, %v1388_v10  ;;  %v443_v24 = vadd.f32 %v442_v16, %v297_v59  ;;  %v556_v26 = vadd.f32 %v555_v19, %v297_v59 }
  0xfc   : > { %v1393_v33 = vclamps-f32 %v441_v21, 1.0  ;;  %v1395_v36 = vclamps-f32 %v554_v23, 1.0  ;;  %v322_v23 = vpop.permute.xlu1 %321 }
  0xfd   : > { %v446_v25 = vpop.f32.mrb[6].mxu0  ;;  %1470 = vmatprep.subr.bf16.mxu0 %v1469_v18  ;;  %v559_v28 = vpop.f32.mrb[6].mxu1  ;;  %1486 = vmatprep.subr.bf16.mxu1 %v1485_v20  ;;  %v1394_v37 = vclamps-f32 %v443_v24, 1.0  ;;  %v1396_v41 = vclamps-f32 %v556_v26, 1.0 }
  0xfe   : > { %v447_v27 = vadd.f32 %v446_v25, %v302_v22  ;;  %v448_v29 = vpop.f32.mrb[7].mxu0  ;;  %1472 = vmatpush1.bf16.msra.mxu0 %v1471_v11  ;;  %v560_v30 = vadd.f32 %v559_v28, %v302_v22  ;;  %v561_v32 = vpop.f32.mrb[7].mxu1  ;;  %1488 = vmatpush1.bf16.msra.mxu1 %v1487_v17 }
  0xff   : > { %v449_v31 = vadd.f32 %v448_v29, %v302_v22  ;;  %v562_v35 = vadd.f32 %v561_v32, %v302_v22  ;;  %v317_v17 = vpop.permute.xlu0 %316 }
 0x100   : > { %v1397_v34 = vclamps-f32 %v447_v27, 1.0  ;;  %v1399_v38 = vclamps-f32 %v560_v30, 1.0 }
 0x101   : > { %v1398_v39 = vclamps-f32 %v449_v31, 1.0  ;;  %v452_v40 = vpop.f32.mrb[8].mxu0  ;;  %v1400_v43 = vclamps-f32 %v562_v35, 1.0  ;;  %v565_v44 = vpop.f32.mrb[8].mxu1 }
 0x102   : > { %v1475_v42 = vpack.c.bf16 %v1397_v34, %v1393_v33  ;;  %v454_v45 = vpop.f32.mrb[9].mxu0  ;;  %v1491_v47 = vpack.c.bf16 %v1399_v38, %v1395_v36  ;;  %v567_v49 = vpop.f32.mrb[9].mxu1  ;;  %v453_v51 = vadd.f32 %v452_v40, %v307_v46  ;;  %v566_v53 = vadd.f32 %v565_v44, %v307_v46 }
 0x103   : > { %v1473_v48 = vpack.c.bf16 %v1398_v39, %v1394_v37  ;;  %v1489_v50 = vpack.c.bf16 %v1400_v43, %v1396_v41  ;;  %v455_v54 = vadd.f32 %v454_v45, %v307_v46  ;;  %v568_v56 = vadd.f32 %v567_v49, %v307_v46  ;;  %v654_v49 = vld [vmem:[%s1847_s2 + $0x10] sm:$0xff] }
 0x104   : > { %v1401_v63 = vclamps-f32 %v453_v51, 1.0  ;;  %v1403_v3 = vclamps-f32 %v566_v53, 1.0  ;;  %v656_v51 = vld [vmem:[%s1847_s2 + $0x20] sm:$0xff]  ;;  %v658_v53 = vld [vmem:[%s1847_s2 + $0x30] sm:$0xff] }
 0x105   : > { %v458_v55 = vpop.f32.mrb[10].mxu0  ;;  %1474 = vmatprep.subr.bf16.mxu0 %v1473_v48  ;;  %v571_v58 = vpop.f32.mrb[10].mxu1  ;;  %1490 = vmatprep.subr.bf16.mxu1 %v1489_v50  ;;  %v1402_v4 = vclamps-f32 %v455_v54, 1.0  ;;  %v1404_v10 = vclamps-f32 %v568_v56, 1.0  ;;  %v653_v48 = vld [vmem:[%s1847_s2 + $0x8] sm:$0xff]  ;;  %v655_v50 = vld [vmem:[%s1847_s2 + $0x18] sm:$0xff] }
 0x106   : > { %v459_v57 = vadd.f32 %v458_v55, %v312_v52  ;;  %v460_v59 = vpop.f32.mrb[11].mxu0  ;;  %1476 = vmatpush1.bf16.msra.mxu0 %v1475_v42  ;;  %v572_v60 = vadd.f32 %v571_v58, %v312_v52  ;;  %v573_v62 = vpop.f32.mrb[11].mxu1  ;;  %1492 = vmatpush1.bf16.msra.mxu1 %v1491_v47  ;;  %v652_v47 = vld [vmem:[%s1847_s2] sm:$0xff]  ;;  %v659_v54 = vld [vmem:[%s1847_s2 + $0x38] sm:$0xff] }
 0x107   : > { %v461_v61 = vadd.f32 %v460_v59, %v312_v52  ;;  %v574_v2 = vadd.f32 %v573_v62, %v312_v52  ;;  %v657_v52 = vld [vmem:[%s1847_s2 + $0x28] sm:$0xff]  ;;  %v663_v58 = vpop.permute.xlu0 %662 }
 0x108   : > { %v1405_v1 = vclamps-f32 %v459_v57, 1.0  ;;  %v1407_v5 = vclamps-f32 %v572_v60, 1.0 }
 0x109   : > { %v1406_v8 = vclamps-f32 %v461_v61, 1.0  ;;  %v464_v9 = vpop.f32.mrb[12].mxu0  ;;  %v1408_v12 = vclamps-f32 %v574_v2, 1.0  ;;  %v577_v13 = vpop.f32.mrb[12].mxu1 }
 0x10a   : > { %v1479_v11 = vpack.c.bf16 %v1405_v1, %v1401_v63  ;;  %v466_v16 = vpop.f32.mrb[13].mxu0  ;;  %v1495_v18 = vpack.c.bf16 %v1407_v5, %v1403_v3  ;;  %v579_v20 = vpop.f32.mrb[13].mxu1  ;;  %v465_v22 = vadd.f32 %v464_v9, %v317_v17  ;;  %v578_v24 = vadd.f32 %v577_v13, %v317_v17 }
 0x10b   : > { %v1477_v19 = vpack.c.bf16 %v1406_v8, %v1402_v4  ;;  %v1493_v21 = vpack.c.bf16 %v1408_v12, %v1404_v10  ;;  %v467_v25 = vadd.f32 %v466_v16, %v317_v17  ;;  %v580_v27 = vadd.f32 %v579_v20, %v317_v17  ;;  %v668_v61 = vpop.permute.xlu1 %667 }
 0x10c   : > { %v1409_v34 = vclamps-f32 %v465_v22, 1.0  ;;  %v1411_v37 = vclamps-f32 %v578_v24, 1.0 }
 0x10d   : > { %v470_v26 = vpop.f32.mrb[14].mxu0  ;;  %1478 = vmatprep.subr.bf16.mxu0 %v1477_v19  ;;  %v583_v29 = vpop.f32.mrb[14].mxu1  ;;  %1494 = vmatprep.subr.bf16.mxu1 %v1493_v21  ;;  %v1410_v38 = vclamps-f32 %v467_v25, 1.0  ;;  %v1412_v41 = vclamps-f32 %v580_v27, 1.0 }
 0x10e   : > { %v471_v28 = vadd.f32 %v470_v26, %v322_v23  ;;  %v472_v30 = vpop.f32.mrb[15].mxu0  ;;  %1480 = vmatpush1.bf16.msra.mxu0 %v1479_v11  ;;  %v584_v31 = vadd.f32 %v583_v29, %v322_v23  ;;  %v585_v33 = vpop.f32.mrb[15].mxu1  ;;  %1496 = vmatpush1.bf16.msra.mxu1 %v1495_v18 }
 0x10f   : > { %v473_v32 = vadd.f32 %v472_v30, %v322_v23  ;;  %v586_v36 = vadd.f32 %v585_v33, %v322_v23  ;;  %v673_v25 = vpop.permute.xlu0 %672 }
 0x110   : > { %v1413_v35 = vclamps-f32 %v471_v28, 1.0  ;;  %v1415_v39 = vclamps-f32 %v584_v31, 1.0  ;;  %v678_v31 = vpop.permute.xlu1 %677 }
 0x111   : > { %v1414_v40 = vclamps-f32 %v473_v32, 1.0  ;;  %v1416_v43 = vclamps-f32 %v586_v36, 1.0 }
 0x112   : > { %v1483_v42 = vpack.c.bf16 %v1413_v35, %v1409_v34  ;;  %v1499_v44 = vpack.c.bf16 %v1415_v39, %v1411_v37 }
 0x113   : > { %v1481_v45 = vpack.c.bf16 %v1414_v40, %v1410_v38  ;;  %v1497_v46 = vpack.c.bf16 %v1416_v43, %v1412_v41 }
 0x115   : > { %1482 = vmatprep.subr.bf16.mxu0 %v1481_v45  ;;  %1498 = vmatprep.subr.bf16.mxu1 %v1497_v46 }
 0x116   : > { %1484 = vmatpush1.bf16.msra.mxu0 %v1483_v42  ;;  %1500 = vmatpush1.bf16.msra.mxu1 %v1499_v44 }
 0x119   : > { %1417 = vmatmul.mubr.msk.f32.vlgmr.msra.gmra.mrb[16].mxu0 %vm700_vm3, %v652_v47  ;;  %1425 = vmatmul.mubr.msk.f32.vlgmr.msra.gmra.mrb[16].mxu1 %vm700_vm3, %v652_v47 }
 0x11a   : > { %795 = vmatprep.mubr.f32.mxu0 %v1571_v0  ;;  %908 = vmatprep.mubr.f32.mxu1 %v1571_v0 }
 0x11d   : > { %1418 = vmatmul.mubr.msk.f32.gmra.mrb[18].mxu0 %vm700_vm3, %v653_v48  ;;  %1426 = vmatmul.mubr.msk.f32.gmra.mrb[18].mxu1 %vm700_vm3, %v653_v48 }
 0x11e   : > { %801 = vmatprep.mubr.f32.mxu0 %v1571_v0  ;;  %914 = vmatprep.mubr.f32.mxu1 %v1571_v0 }
 0x121   : > { %1419 = vmatmul.mubr.msk.f32.gmra.mrb[20].mxu0 %vm700_vm3, %v654_v49  ;;  %1427 = vmatmul.mubr.msk.f32.gmra.mrb[20].mxu1 %vm700_vm3, %v654_v49 }
 0x122   : > { %807 = vmatprep.mubr.f32.mxu0 %v1571_v0  ;;  %920 = vmatprep.mubr.f32.mxu1 %v1571_v0 }
 0x125   : > { %1420 = vmatmul.mubr.msk.f32.gmra.mrb[22].mxu0 %vm700_vm3, %v655_v50  ;;  %1428 = vmatmul.mubr.msk.f32.gmra.mrb[22].mxu1 %vm700_vm3, %v655_v50 }
 0x126   : > { %813 = vmatprep.mubr.f32.mxu0 %v1571_v0  ;;  %926 = vmatprep.mubr.f32.mxu1 %v1571_v0 }
 0x129   : > { %1421 = vmatmul.mubr.msk.f32.gmra.mrb[24].mxu0 %vm700_vm3, %v656_v51  ;;  %1429 = vmatmul.mubr.msk.f32.gmra.mrb[24].mxu1 %vm700_vm3, %v656_v51 }
 0x12a   : > { %819 = vmatprep.mubr.f32.mxu0 %v1571_v0  ;;  %932 = vmatprep.mubr.f32.mxu1 %v1571_v0 }
 0x12d   : > { %1422 = vmatmul.mubr.msk.f32.gmra.mrb[26].mxu0 %vm700_vm3, %v657_v52  ;;  %1430 = vmatmul.mubr.msk.f32.gmra.mrb[26].mxu1 %vm700_vm3, %v657_v52 }
 0x12e   : > { %825 = vmatprep.mubr.f32.mxu0 %v1571_v0  ;;  %938 = vmatprep.mubr.f32.mxu1 %v1571_v0 }
 0x131   : > { %1423 = vmatmul.mubr.msk.f32.gmra.mrb[28].mxu0 %vm700_vm3, %v658_v53  ;;  %1431 = vmatmul.mubr.msk.f32.gmra.mrb[28].mxu1 %vm700_vm3, %v658_v53 }
 0x132   : > { %831 = vmatprep.mubr.f32.mxu0 %v1571_v0  ;;  %944 = vmatprep.mubr.f32.mxu1 %v1571_v0 }
 0x135   : > { %1424 = vmatmul.mubr.msk.f32.gmra.mrb[30].mxu0 %vm700_vm3, %v659_v54  ;;  %1432 = vmatmul.mubr.msk.f32.gmra.mrb[30].mxu1 %vm700_vm3, %v659_v54 }
 0x136   : > { %1088 = vmatprep.mubr.f32.mxu0 %v1571_v0  ;;  %1159 = vmatprep.mubr.f32.mxu1 %v1571_v0 }
 0x1ec   : > { %v791_v55 = vpop.f32.mrb[16].mxu0  ;;  %v904_v56 = vpop.f32.mrb[16].mxu1 }
 0x1ed   : > { %v793_v57 = vpop.f32.mrb[17].mxu0  ;;  %v906_v59 = vpop.f32.mrb[17].mxu1  ;;  %v792_v60 = vadd.f32 %v791_v55, %v663_v58  ;;  %v905_v62 = vadd.f32 %v904_v56, %v663_v58 }
 0x1ee   : > { %v794_v63 = vadd.f32 %v793_v57, %v663_v58  ;;  %v907_v2 = vadd.f32 %v906_v59, %v663_v58  ;;  %v683_v55 = vpop.permute.xlu0 %682 }
 0x1ef   : > { %v1433_v11 = vclamps-f32 %v792_v60, 1.0  ;;  %v1435_v13 = vclamps-f32 %v905_v62, 1.0 }
 0x1f0   : > { %v797_v1 = vpop.f32.mrb[18].mxu0  ;;  %v910_v4 = vpop.f32.mrb[18].mxu1  ;;  %v1434_v16 = vclamps-f32 %v794_v63, 1.0  ;;  %v1436_v20 = vclamps-f32 %v907_v2, 1.0 }
 0x1f1   : > { %v798_v3 = vadd.f32 %v797_v1, %v668_v61  ;;  %v799_v5 = vpop.f32.mrb[19].mxu0  ;;  %v911_v8 = vadd.f32 %v910_v4, %v668_v61  ;;  %v912_v10 = vpop.f32.mrb[19].mxu1 }
 0x1f2   : > { %v800_v9 = vadd.f32 %v799_v5, %v668_v61  ;;  %v913_v0 = vadd.f32 %v912_v10, %v668_v61  ;;  %v688_v61 = vpop.permute.xlu1 %687 }
 0x1f3   : > { %v1437_v12 = vclamps-f32 %v798_v3, 1.0  ;;  %v1439_v17 = vclamps-f32 %v911_v8, 1.0 }
 0x1f4   : > { %v1438_v18 = vclamps-f32 %v800_v9, 1.0  ;;  %v803_v19 = vpop.f32.mrb[20].mxu0  ;;  %v1440_v22 = vclamps-f32 %v913_v0, 1.0  ;;  %v916_v23 = vpop.f32.mrb[20].mxu1 }
 0x1f5   : > { %v1503_v21 = vpack.c.bf16 %v1437_v12, %v1433_v11  ;;  %v805_v24 = vpop.f32.mrb[21].mxu0  ;;  %v1519_v26 = vpack.c.bf16 %v1439_v17, %v1435_v13  ;;  %v918_v28 = vpop.f32.mrb[21].mxu1  ;;  %v804_v30 = vadd.f32 %v803_v19, %v673_v25  ;;  %v917_v32 = vadd.f32 %v916_v23, %v673_v25 }
 0x1f6   : > { %v1501_v27 = vpack.c.bf16 %v1438_v18, %v1434_v16  ;;  %v1517_v29 = vpack.c.bf16 %v1440_v22, %v1436_v20  ;;  %v806_v33 = vadd.f32 %v805_v24, %v673_v25  ;;  %v919_v35 = vadd.f32 %v918_v28, %v673_v25  ;;  %v693_v25 = vpop.permute.xlu0 %692 }
 0x1f7   : > { %v1441_v42 = vclamps-f32 %v804_v30, 1.0  ;;  %v1443_v45 = vclamps-f32 %v917_v32, 1.0 }
 0x1f8   : > { %v809_v34 = vpop.f32.mrb[22].mxu0  ;;  %1502 = vmatprep.subr.bf16.mxu0 %v1501_v27  ;;  %v922_v37 = vpop.f32.mrb[22].mxu1  ;;  %1518 = vmatprep.subr.bf16.mxu1 %v1517_v29  ;;  %v1442_v46 = vclamps-f32 %v806_v33, 1.0  ;;  %v1444_v50 = vclamps-f32 %v919_v35, 1.0 }
 0x1f9   : > { %v810_v36 = vadd.f32 %v809_v34, %v678_v31  ;;  %v811_v38 = vpop.f32.mrb[23].mxu0  ;;  %1504 = vmatpush1.bf16.msra.mxu0 %v1503_v21  ;;  %v923_v39 = vadd.f32 %v922_v37, %v678_v31  ;;  %v924_v41 = vpop.f32.mrb[23].mxu1  ;;  %1520 = vmatpush1.bf16.msra.mxu1 %v1519_v26 }
 0x1fa   : > { %v812_v40 = vadd.f32 %v811_v38, %v678_v31  ;;  %v925_v44 = vadd.f32 %v924_v41, %v678_v31  ;;  %v698_v31 = vpop.permute.xlu1 %697 }
 0x1fb   : > { %v1445_v43 = vclamps-f32 %v810_v36, 1.0  ;;  %v1447_v47 = vclamps-f32 %v923_v39, 1.0 }
 0x1fc   : > { %v1446_v48 = vclamps-f32 %v812_v40, 1.0  ;;  %v815_v49 = vpop.f32.mrb[24].mxu0  ;;  %v1448_v52 = vclamps-f32 %v925_v44, 1.0  ;;  %v928_v53 = vpop.f32.mrb[24].mxu1 }
 0x1fd   : > { %v1507_v51 = vpack.c.bf16 %v1445_v43, %v1441_v42  ;;  %v817_v54 = vpop.f32.mrb[25].mxu0  ;;  %v1523_v56 = vpack.c.bf16 %v1447_v47, %v1443_v45  ;;  %v930_v58 = vpop.f32.mrb[25].mxu1  ;;  %v816_v60 = vadd.f32 %v815_v49, %v683_v55  ;;  %v929_v62 = vadd.f32 %v928_v53, %v683_v55 }
 0x1fe   : > { %v1505_v57 = vpack.c.bf16 %v1446_v48, %v1442_v46  ;;  %v1521_v59 = vpack.c.bf16 %v1448_v52, %v1444_v50  ;;  %v818_v63 = vadd.f32 %v817_v54, %v683_v55  ;;  %v931_v2 = vadd.f32 %v930_v58, %v683_v55  ;;  %v1015_v55 = vld [vmem:[%s1848_s3] sm:$0x7] }
 0x1ff   : > { %v1449_v11 = vclamps-f32 %v816_v60, 1.0  ;;  %v1451_v13 = vclamps-f32 %v929_v62, 1.0  ;;  %v1207_v60 = vmul.f32 %v1653_v15, %v1653_v15 }
 0x200   : > { %v821_v1 = vpop.f32.mrb[26].mxu0  ;;  %1506 = vmatprep.subr.bf16.mxu0 %v1505_v57  ;;  %v934_v4 = vpop.f32.mrb[26].mxu1  ;;  %1522 = vmatprep.subr.bf16.mxu1 %v1521_v59  ;;  %v1450_v16 = vclamps-f32 %v818_v63, 1.0  ;;  %v1452_v20 = vclamps-f32 %v931_v2, 1.0  ;;  %v1206_v57 = vmul.f32 %v1650_v14, %v1650_v14  ;;  %v1167_v59 = vmul.f32 %v1635_v7, %v1635_v7 }
 0x201   : > { %v822_v3 = vadd.f32 %v821_v1, %v688_v61  ;;  %v823_v5 = vpop.f32.mrb[27].mxu0  ;;  %1508 = vmatpush1.bf16.msra.mxu0 %v1507_v51  ;;  %v935_v8 = vadd.f32 %v934_v4, %v688_v61  ;;  %v936_v10 = vpop.f32.mrb[27].mxu1  ;;  %1524 = vmatpush1.bf16.msra.mxu1 %v1523_v56  ;;  %v1166_v56 = vmul.f32 %v1633_v6, %v1633_v6 }
 0x202   : > { %v824_v9 = vadd.f32 %v823_v5, %v688_v61  ;;  %v937_v0 = vadd.f32 %v936_v10, %v688_v61  ;;  %v1210_v61 = vcombine.high %v1206_v57, %v1206_v57  ;;  %v1171_v1 = vcombine.high %v1167_v59, %v1167_v59 }
 0x203   : > { %v1453_v12 = vclamps-f32 %v822_v3, 1.0  ;;  %v1455_v17 = vclamps-f32 %v935_v8, 1.0  ;;  %v1170_v58 = vcombine.high %v1166_v56, %v1166_v56  ;;  %v1174_v62 = vsel %vm271_vm0, %v1166_v56, 0.0 }
 0x204   : > { %v1454_v18 = vclamps-f32 %v824_v9, 1.0  ;;  %v827_v19 = vpop.f32.mrb[28].mxu0  ;;  %v1456_v22 = vclamps-f32 %v937_v0, 1.0  ;;  %v940_v23 = vpop.f32.mrb[28].mxu1  ;;  %v1214_v2 = vsel %vm271_vm0, %v1206_v57, 0.0  ;;  %v1211_v3 = vcombine.high %v1207_v60, %v1207_v60 }
 0x205   : > { %v1511_v21 = vpack.c.bf16 %v1453_v12, %v1449_v11  ;;  %v829_v24 = vpop.f32.mrb[29].mxu0  ;;  %v1527_v26 = vpack.c.bf16 %v1455_v17, %v1451_v13  ;;  %v942_v28 = vpop.f32.mrb[29].mxu1  ;;  %v828_v30 = vadd.f32 %v827_v19, %v693_v25  ;;  %v941_v32 = vadd.f32 %v940_v23, %v693_v25 }
 0x206   : > { %v1509_v27 = vpack.c.bf16 %v1454_v18, %v1450_v16  ;;  %v1525_v29 = vpack.c.bf16 %v1456_v22, %v1452_v20  ;;  %v830_v33 = vadd.f32 %v829_v24, %v693_v25  ;;  %v943_v35 = vadd.f32 %v942_v28, %v693_v25 }
 0x207   : > { %v1457_v42 = vclamps-f32 %v828_v30, 1.0  ;;  %v1459_v45 = vclamps-f32 %v941_v32, 1.0  ;;  %v1181_v63 = vsel %vm271_vm0, %v1170_v58, 0.0  ;;  %v1175_v4 = vrot.slane %v1174_v62, 4 }
 0x208   : > { %v833_v34 = vpop.f32.mrb[30].mxu0  ;;  %1510 = vmatprep.subr.bf16.mxu0 %v1509_v27  ;;  %v946_v37 = vpop.f32.mrb[30].mxu1  ;;  %1526 = vmatprep.subr.bf16.mxu1 %v1525_v29  ;;  %v1458_v46 = vclamps-f32 %v830_v33, 1.0  ;;  %v1460_v49 = vclamps-f32 %v943_v35, 1.0  ;;  %v1221_v5 = vsel %vm271_vm0, %v1210_v61, 0.0  ;;  %v1182_v8 = vrot.slane %v1181_v63, 4 }
 0x209   : > { %v834_v36 = vadd.f32 %v833_v34, %v698_v31  ;;  %v835_v38 = vpop.f32.mrb[31].mxu0  ;;  %1512 = vmatpush1.bf16.msra.mxu0 %v1511_v21  ;;  %v947_v39 = vadd.f32 %v946_v37, %v698_v31  ;;  %v948_v41 = vpop.f32.mrb[31].mxu1  ;;  %1528 = vmatpush1.bf16.msra.mxu1 %v1527_v26  ;;  %v1188_v9 = vsel %vm271_vm0, %v1167_v59, 0.0  ;;  %v1215_v10 = vrot.slane %v1214_v2, 4 }
 0x20a   : > { %v836_v40 = vadd.f32 %v835_v38, %v698_v31  ;;  %v949_v44 = vadd.f32 %v948_v41, %v698_v31  ;;  %v1195_v11 = vsel %vm271_vm0, %v1171_v1, 0.0  ;;  %v1228_v12 = vsel %vm271_vm0, %v1207_v60, 0.0 }
 0x20b   : > { %v1461_v43 = vclamps-f32 %v834_v36, 1.0  ;;  %v1463_v47 = vclamps-f32 %v947_v39, 1.0  ;;  %v1222_v0 = vrot.slane %v1221_v5, 4  ;;  %v1235_v13 = vsel %vm271_vm0, %v1211_v3, 0.0 }
 0x20c   : > { %v1462_v48 = vclamps-f32 %v836_v40, 1.0  ;;  %v1464_v51 = vclamps-f32 %v949_v44, 1.0  ;;  %v1176_v16 = vadd.f32 %v1175_v4, %v1174_v62  ;;  %v1189_v17 = vrot.slane %v1188_v9, 4 }
 0x20d   : > { %v1515_v50 = vpack.c.bf16 %v1461_v43, %v1457_v42  ;;  %v1531_v52 = vpack.c.bf16 %v1463_v47, %v1459_v45  ;;  %v1183_v18 = vadd.f32 %v1182_v8, %v1181_v63  ;;  %v1196_v19 = vrot.slane %v1195_v11, 4 }
 0x20e   : > { %v1513_v53 = vpack.c.bf16 %v1462_v48, %v1458_v46  ;;  %v1529_v54 = vpack.c.bf16 %v1464_v51, %v1460_v49  ;;  %v1229_v20 = vrot.slane %v1228_v12, 4  ;;  %v1216_v21 = vadd.f32 %v1215_v10, %v1214_v2 }
 0x20f   : > { %v1236_v22 = vrot.slane %v1235_v13, 4  ;;  %v1223_v23 = vadd.f32 %v1222_v0, %v1221_v5  ;;  %v1177_v24 = vrot.slane %v1176_v16, 2  ;;  %v1190_v25 = vadd.f32 %v1189_v17, %v1188_v9 }
 0x210   : > { %1514 = vmatprep.subr.bf16.mxu0 %v1513_v53  ;;  %1530 = vmatprep.subr.bf16.mxu1 %v1529_v54  ;;  %v1184_v26 = vrot.slane %v1183_v18, 2  ;;  %v1197_v27 = vadd.f32 %v1196_v19, %v1195_v11  ;;  %v1230_v28 = vadd.f32 %v1229_v20, %v1228_v12  ;;  %v1217_v29 = vrot.slane %v1216_v21, 2  ;;  %v1019_v20 = vpop.permute.xlu0 %1018 }
 0x211   : > { %1516 = vmatpush1.bf16.msra.mxu0 %v1515_v50  ;;  %1532 = vmatpush1.bf16.msra.mxu1 %v1531_v52  ;;  %v1237_v30 = vadd.f32 %v1236_v22, %v1235_v13  ;;  %v1224_v31 = vrot.slane %v1223_v23, 2  ;;  %v1178_v32 = vadd.f32 %v1177_v24, %v1176_v16  ;;  %v1191_v33 = vrot.slane %v1190_v25, 2 }
 0x212   : > { %v1185_v34 = vadd.f32 %v1184_v26, %v1183_v18  ;;  %v1198_v35 = vrot.slane %v1197_v27, 2  ;;  %v1231_v36 = vrot.slane %v1230_v28, 2  ;;  %v1218_v37 = vadd.f32 %v1217_v29, %v1216_v21 }
 0x213   : > { %v1225_v38 = vadd.f32 %v1224_v31, %v1223_v23  ;;  %v1238_v39 = vrot.slane %v1237_v30, 2  ;;  %v1179_v40 = vrot.slane %v1178_v32, 1  ;;  %v1192_v41 = vadd.f32 %v1191_v33, %v1190_v25 }
 0x214   : > { %1465 = vmatmul.mubr.msk.f32.vlgmr.msra.gmra.mrb[32].mxu0 %vm700_vm3, %v1015_v55  ;;  %1466 = vmatmul.mubr.msk.f32.vlgmr.msra.gmra.mrb[32].mxu1 %vm700_vm3, %v1015_v55  ;;  %v1186_v42 = vrot.slane %v1185_v34, 1  ;;  %v1199_v43 = vadd.f32 %v1198_v35, %v1197_v27  ;;  %v1219_v44 = vrot.slane %v1218_v37, 1  ;;  %v1232_v45 = vadd.f32 %v1231_v36, %v1230_v28 }
 0x215   : > { %v1226_v46 = vrot.slane %v1225_v38, 1  ;;  %v1239_v47 = vadd.f32 %v1238_v39, %v1237_v30  ;;  %v1180_v48 = vadd.f32 %v1179_v40, %v1178_v32  ;;  %v1193_v49 = vrot.slane %v1192_v41, 1 }
 0x216   : > { %v1187_v50 = vadd.f32 %v1186_v42, %v1185_v34  ;;  %v1200_v51 = vrot.slane %v1199_v43, 1  ;;  %v1220_v52 = vadd.f32 %v1219_v44, %v1218_v37  ;;  %v1233_v53 = vrot.slane %v1232_v45, 1 }
 0x217   : > { %v1227_v54 = vadd.f32 %v1226_v46, %v1225_v38  ;;  %v1240_v55 = vrot.slane %v1239_v47, 1  ;;  %1547 = vrsqrt.f32 %v1180_v48  ;;  %v1194_v56 = vadd.f32 %v1193_v49, %v1192_v41 }
 0x218   : > { %1549 = vrsqrt.f32 %v1187_v50  ;;  %v1201_v57 = vadd.f32 %v1200_v51, %v1199_v43  ;;  %v1234_v58 = vadd.f32 %v1233_v53, %v1232_v45  ;;  %v1246_v5 = vmul.f32 -2.0, %v1633_v6 }
 0x219   : > { %1551 = vrsqrt.f32 %v1220_v52  ;;  %v1241_v59 = vadd.f32 %v1240_v55, %v1239_v47  ;;  %v1247_v9 = vmul.f32 -2.0, %v1635_v7  ;;  %v1268_v11 = vmul.f32 -0.5, %v1650_v14 }
 0x21a   : > { %1553 = vrsqrt.f32 %v1227_v54  ;;  %v1269_v0 = vmul.f32 -0.5, %v1653_v15 }
 0x21b   : > { %1555 = vrsqrt.f32 %v1194_v56 }
 0x21c   : > { %1557 = vrsqrt.f32 %v1201_v57 }
 0x21d   : > { %1559 = vrsqrt.f32 %v1234_v58 }
 0x21e   : > { %1561 = vrsqrt.f32 %v1241_v59 }
 0x221   : > { %v1548_v60 = vpop.eup %1547 }
 0x222   : > { %v1550_v61 = vpop.eup %1549 }
 0x223   : > { %v1552_v62 = vpop.eup %1551  ;;  %v1252_v8 = vcombine.low %v1548_v60, %v1550_v61 }
 0x224   : > { %v1554_v63 = vpop.eup %1553 }
 0x225   : > { %v1556_v1 = vpop.eup %1555  ;;  %v1274_v12 = vcombine.low %v1552_v62, %v1554_v63  ;;  %v1256_v16 = vmul.f32 %v1252_v8, %v1246_v5 }
 0x226   : > { %v1558_v2 = vpop.eup %1557 }
 0x227   : > { %v1560_v3 = vpop.eup %1559  ;;  %v1253_v10 = vcombine.low %v1556_v1, %v1558_v2  ;;  %v1278_v18 = vmul.f32 %v1274_v12, %v1268_v11  ;;  %v1260_v22 = vcombine.high %v1256_v16, %v1256_v16 }
 0x228   : > { %v1562_v4 = vpop.eup %1561 }
 0x229   : > { %v1275_v13 = vcombine.low %v1560_v3, %v1562_v4  ;;  %v1257_v17 = vmul.f32 %v1253_v10, %v1247_v9  ;;  %v1282_v27 = vcombine.high %v1278_v18, %v1278_v18 }
 0x22b   : > { %v1279_v19 = vmul.f32 %v1275_v13, %v1269_v0  ;;  %v1261_v25 = vcombine.high %v1257_v17, %v1257_v17 }
 0x22d   : > { %v1283_v15 = vcombine.high %v1279_v19, %v1279_v19 }
 0x2e7   : > { %v1090_v21 = vpop.f32.mrb[32].mxu0  ;;  %v1161_v24 = vpop.f32.mrb[32].mxu1 }
 0x2e8   : > { %v1091_v23 = vadd.f32 %v1090_v21, %v1019_v20  ;;  %v1092_v6 = vpop.f32.mrb[33].mxu0  ;;  %v1162_v7 = vadd.f32 %v1161_v24, %v1019_v20  ;;  %v1163_v14 = vpop.f32.mrb[33].mxu1 }
 0x2e9   : > { %v1093_v26 = vadd.f32 %v1092_v6, %v1019_v20  ;;  %v1164_v29 = vadd.f32 %v1163_v14, %v1019_v20 }
 0x2ea   : > { %v1264_v28 = vadd.f32 %v1256_v16, %v1091_v23  ;;  %v1266_v30 = vadd.f32 %v1257_v17, %v1162_v7 }
 0x2eb   : > { %v1265_v31 = vadd.f32 %v1260_v22, %v1093_v26  ;;  %v1267_v33 = vadd.f32 %v1261_v25, %v1164_v29 }
 0x2ec   : > { %v1286_v32 = vadd.f32 %v1278_v18, %v1264_v28  ;;  %v1288_v34 = vadd.f32 %v1279_v19, %v1266_v30 }
 0x2ed   : > { %v1287_v35 = vadd.f32 %v1282_v27, %v1265_v31  ;;  %v1289_v36 = vadd.f32 %v1283_v15, %v1267_v33 }
 0x2ef   : > { %v1294_v37 = vcombine.low %v1286_v32, %v1287_v35  ;;  %v1295_v38 = vcombine.low %v1288_v34, %v1289_v36 }
 0x2f1   : > { %1298 = vst [vmem:[%s226_s29] sm:$0x77] %v1294_v37  ;;  %1299 = vst [vmem:[%s226_s29 + $0x8] sm:$0x77] %v1295_v38 }
 0x2f2 PF: > { %s15_s18 = sadd.s32 1, %s1569_s18  }
 0x2f3   : > { %p12_p4 = scmp.ge.s32.totalorder %s15_s18, 4  }
 0x2f5   :  { %14 = sbr.rel (!%p12_p4) target bundleno = 1 (0x1), region = 70 }

</bundles_post_ra>
